<compile_context>
chip_gen: v7x
topology: tpu7x:2x2x1
jax: 0.10.0
libtpu: 0.0.40
codegen_flags: <defaults>
</compile_context>

<pallas_src>
import functools

import jax
import jax.numpy as jnp
from jax import lax
from jax.experimental import pallas as pl
from jax.experimental.pallas import tpu as pltpu


_VMEM_LIMIT_BYTES = 32 * 1024 * 1024    # scoped VMEM requested (safe on v5e/v6e/v7x)
_INPUT_VMEM_BUDGET = 16 * 1024 * 1024   # budget for double-buffered input streams
_N_ROW_SPLITS = 2                       # outer parallel split (2 TCs on v7x)


def _softplus(x):
    # Numerically stable softplus(x) = log(1 + exp(x)); exp + log = 2 EUP ops.
    return jnp.maximum(x, 0.0) + jnp.log(1.0 + jnp.exp(-jnp.abs(x)))


def _rowgroup_sum(x):
    """(tile_r, C) -> (8, C) partial sum using only cross-vreg VPU adds."""
    c = x.shape[-1]
    return x.reshape(-1, 8, c).sum(axis=0)


def _first_row_sum(x):
    """(tile_r, C) -> (8, C) with the column sums in row 0 (small-tile path)."""
    c = x.shape[-1]
    s = jnp.sum(x, axis=0, keepdims=True)                    # (1, C)
    sel = lax.broadcasted_iota(jnp.int32, (8, 1), 0) == 0    # (8, 1)
    return jnp.where(sel, s, 0.0)                            # (8, C)


def _row_validity(tile_r, n_rows):
    """(tile_r, 1) bool mask: rows of this tile that fall inside the real array."""
    blk = pl.program_id(0) * pl.num_programs(1) + pl.program_id(1)
    row0 = blk * tile_r
    rid = row0 + lax.broadcasted_iota(jnp.int32, (tile_r, 1), 0)
    return rid < n_rows


def _ce_kernel_masked(pos_ref, neg_ref, mask_ref, num_ref, den_ref,
                      *, tile_r, n_rows, need_row_mask):
    i = pl.program_id(1)

    @pl.when(i == 0)
    def _():
        num_ref[...] = jnp.zeros_like(num_ref)
        den_ref[...] = jnp.zeros_like(den_ref)

    pos = pos_ref[...].astype(jnp.float32)
    neg = neg_ref[...].astype(jnp.float32)
    m = mask_ref[...].astype(jnp.float32)

    t = _softplus(-pos) + _softplus(neg)

    if need_row_mask:
        valid = _row_validity(tile_r, n_rows)
        t = jnp.where(valid, t, 0.0)
        m = jnp.where(valid, m, 0.0)

    part = _rowgroup_sum if tile_r % 8 == 0 else _first_row_sum
    num_ref[...] += part(t * m)
    den_ref[...] += part(m)


def _ce_kernel_unmasked(pos_ref, neg_ref, num_ref, *, tile_r, n_rows, need_row_mask):
    i = pl.program_id(1)

    @pl.when(i == 0)
    def _():
        num_ref[...] = jnp.zeros_like(num_ref)

    pos = pos_ref[...].astype(jnp.float32)
    neg = neg_ref[...].astype(jnp.float32)

    t = _softplus(-pos) + _softplus(neg)
    if need_row_mask:
        t = jnp.where(_row_validity(tile_r, n_rows), t, 0.0)

    part = _rowgroup_sum if tile_r % 8 == 0 else _first_row_sum
    num_ref[...] += part(t)


def _choose_cols(n):
    # The loss is a flat reduction, so any (rows, cols) re-factorization of the
    # flattened input is valid; pick a lane-dense cols with a decent row count.
    for c in (1024, 512, 256, 128):
        if n % c == 0 and n // c >= 8:
            return c
    for c in (1024, 512, 256, 128):
        if n % c == 0:
            return c
    return n    # tiny / awkward sizes: single full-width row


def _ce_pallas_2d(pos2d, neg2d, mask2d, max_rows_per_tile):
    rows, cols = pos2d.shape
    has_mask = mask2d is not None
    streams = (pos2d, neg2d, mask2d) if has_mask else (pos2d, neg2d)

    itemsizes = [jnp.dtype(s.dtype).itemsize for s in streams]
    bytes_per_row = 2 * cols * sum(itemsizes)          # x2: double-buffered DMA
    row_align = max(8, max(32 // it for it in itemsizes))
    tile_r = max(1, _INPUT_VMEM_BUDGET // bytes_per_row)
    if max_rows_per_tile is not None:
        tile_r = min(tile_r, max_rows_per_tile)
    if tile_r >= rows:
        tile_r = rows                                   # one row-block (full dim)
    else:
        tile_r = max(row_align, (tile_r // row_align) * row_align)

    n_blocks = pl.cdiv(rows, tile_r)
    n_splits = min(_N_ROW_SPLITS, n_blocks)
    n_inner = pl.cdiv(n_blocks, n_splits)
    # row masking only needed if the block walk over-covers the real rows
    need_row_mask = (n_blocks * tile_r != rows) or (n_splits * n_inner != n_blocks)

    def in_map(o, i):
        # clamp so over-coverage steps re-read the last block (then masked to 0)
        return (jnp.minimum(o * n_inner + i, n_blocks - 1), 0)

    in_spec = pl.BlockSpec((tile_r, cols), in_map)
    out_spec = pl.BlockSpec((8, cols), lambda o, i: (o, 0))
    out_sds = jax.ShapeDtypeStruct((n_splits * 8, cols), jnp.float32)

    common = dict(tile_r=tile_r, n_rows=rows, need_row_mask=need_row_mask)
    if has_mask:
        kernel = functools.partial(_ce_kernel_masked, **common)
        in_specs = [in_spec, in_spec, in_spec]
        out_shape = (out_sds, out_sds)
        out_specs = (out_spec, out_spec)
    else:
        kernel = functools.partial(_ce_kernel_unmasked, **common)
        in_specs = [in_spec, in_spec]
        out_shape = out_sds
        out_specs = out_spec

    out = pl.pallas_call(
        kernel,
        out_shape=out_shape,
        grid_spec=pltpu.PrefetchScalarGridSpec(
            num_scalar_prefetch=0,
            grid=(n_splits, n_inner),
            in_specs=in_specs,
            out_specs=out_specs,
        ),
        compiler_params=pltpu.CompilerParams(
            dimension_semantics=("parallel", "arbitrary"),
            vmem_limit_bytes=_VMEM_LIMIT_BYTES,
        ),
    )(*streams)

    if has_mask:
        num, den = out
        return jnp.sum(num) / jnp.sum(den)
    return jnp.sum(out) / jnp.float32(rows * cols)


@functools.partial(jax.jit, static_argnames=("max_rows_per_tile",))
def pointwise_ce_loss(pos_logits, neg_logits, mask=None, max_rows_per_tile=None):
    """JAX/Pallas equivalent of PointWiseCEloss.forward."""
    assert neg_logits.shape == pos_logits.shape
    cols = _choose_cols(pos_logits.size)
    pos2d = pos_logits.reshape(-1, cols)
    neg2d = neg_logits.reshape(-1, cols)
    if mask is None:
        mask2d = None
    else:
        assert mask.shape == pos_logits.shape
        m = mask.astype(jnp.float32) if mask.dtype == jnp.bool_ else mask
        mask2d = m.reshape(-1, cols)
    return _ce_pallas_2d(pos2d, neg2d, mask2d, max_rows_per_tile)


def _reference(pos, neg, mask=None):
    pos = pos.astype(jnp.float32)
    neg = neg.astype(jnp.float32)
    m = jnp.ones_like(pos) if mask is None else mask.astype(jnp.float32)
    sp = jax.nn.sigmoid(pos)
    sn = jax.nn.sigmoid(neg)
    num = jnp.sum(-jnp.log(sp + 1e-24) * m - jnp.log(1.0 - sn + 1e-24) * m)
    return num / jnp.sum(m)


def _check(name, got, want, rtol=1e-4, atol=1e-4):
    got = jax.block_until_ready(got)
    assert jnp.isfinite(got), (name, got)
    assert jnp.allclose(got, want, rtol=rtol, atol=atol), (name, got, want)


if __name__ == "__main__":
    key = jax.random.PRNGKey(0)
    k = jax.random.split(key, 9)

    # 1) f32, masked, default (VMEM-sized) tiling
    pos1 = jax.random.normal(k[0], (16, 128), dtype=jnp.float32)
    neg1 = jax.random.normal(k[1], (16, 128), dtype=jnp.float32)
    mask1 = (jax.random.uniform(k[2], (16, 128)) > 0.3).astype(jnp.float32)
    _check("masked_f32", pointwise_ce_loss(pos1, neg1, mask1),
           _reference(pos1, neg1, mask1))

    # 2) mask=None specialization (2-stream kernel, constant denominator)
    _check("unmasked_f32", pointwise_ce_loss(pos1, neg1),
           _reference(pos1, neg1))

    # 3) awkward row count + forced small tiles: multi-block grid, 2-way row
    #    split, partial edge block and in-kernel row masking.
    pos3 = jax.random.normal(k[3], (13, 384), dtype=jnp.float32)
    neg3 = jax.random.normal(k[4], (13, 384), dtype=jnp.float32)
    mask3 = (jax.random.uniform(k[5], (13, 384)) > 0.5).astype(jnp.float32)
    _check("masked_f32_tiled",
           pointwise_ce_loss(pos3, neg3, mask3, max_rows_per_tile=16),
           _reference(pos3, neg3, mask3))
    # same shape, single full-array block (row count not a multiple of 8)
    _check("masked_f32_fullblock", pointwise_ce_loss(pos3, neg3, mask3),
           _reference(pos3, neg3, mask3))

    # 4) bf16 logits streamed natively (cast to f32 inside the kernel)
    pos4 = jax.random.normal(k[6], (64, 256), dtype=jnp.bfloat16)
    neg4 = jax.random.normal(k[7], (64, 256), dtype=jnp.bfloat16)
    mask4 = (jax.random.uniform(k[8], (64, 256)) > 0.3).astype(jnp.float32)
    _check("masked_bf16", pointwise_ce_loss(pos4, neg4, mask4),
           _reference(pos4, neg4, mask4))

    print("KERNEL_OK")
</pallas_src>

<mosaic_0001>
module attributes {stable_mosaic.version = 11 : i64} {
  func.func @_ce_kernel_masked(%arg0: i32, %arg1: i32, %arg2: memref<8x256xf32, #tpu.memory_space<vmem>>, %arg3: memref<8x256xf32, #tpu.memory_space<vmem>>, %arg4: memref<8x256xf32, #tpu.memory_space<vmem>>, %arg5: memref<8x256xf32, #tpu.memory_space<vmem>>, %arg6: memref<8x256xf32, #tpu.memory_space<vmem>>) attributes {dimension_semantics = [#tpu.dimension_semantics<parallel>, #tpu.dimension_semantics<arbitrary>], iteration_bounds = array<i64: 1, 1>, scalar_prefetch = 0 : i64, scratch_operands = 0 : i64, tpu.core_type = #tpu.core_type<tc>, window_params = [{transform_indices = @transform_0, window_bounds = array<i64: 8, 256>}, {transform_indices = @transform_1, window_bounds = array<i64: 8, 256>}, {transform_indices = @transform_2, window_bounds = array<i64: 8, 256>}, {transform_indices = @transform_3, window_bounds = array<i64: 8, 256>}, {transform_indices = @transform_4, window_bounds = array<i64: 8, 256>}]} {
    %c0_i32 = arith.constant 0 : i32
    %0 = arith.cmpi eq, %arg1, %c0_i32 : i32
    %1 = arith.extui %0 : i1 to i32
    %c0_i32_0 = arith.constant 0 : i32
    %2 = arith.cmpi ne, %1, %c0_i32_0 : i32
    scf.if %2 {
      %cst_22 = arith.constant 0.000000e+00 : f32
      %40 = vector.broadcast %cst_22 : f32 to vector<8x256xf32>
      %c0_23 = arith.constant 0 : index
      %c0_24 = arith.constant 0 : index
      %41 = vector.load %arg5[%c0_23, %c0_24] : memref<8x256xf32, #tpu.memory_space<vmem>>, vector<8x256xf32>
      tpu.vector_store %arg5[%c0_23, %c0_24], %40 {strides = array<i32>} : memref<8x256xf32, #tpu.memory_space<vmem>>, vector<8x256xf32>,
      %cst_25 = arith.constant 0.000000e+00 : f32
      %42 = vector.broadcast %cst_25 : f32 to vector<8x256xf32>
      %c0_26 = arith.constant 0 : index
      %c0_27 = arith.constant 0 : index
      %43 = vector.load %arg6[%c0_26, %c0_27] : memref<8x256xf32, #tpu.memory_space<vmem>>, vector<8x256xf32>
      tpu.vector_store %arg6[%c0_26, %c0_27], %42 {strides = array<i32>} : memref<8x256xf32, #tpu.memory_space<vmem>>, vector<8x256xf32>,
    } else {
    }
    %c0 = arith.constant 0 : index
    %c0_1 = arith.constant 0 : index
    %3 = vector.load %arg2[%c0, %c0_1] : memref<8x256xf32, #tpu.memory_space<vmem>>, vector<8x256xf32>
    %c0_2 = arith.constant 0 : index
    %c0_3 = arith.constant 0 : index
    %4 = vector.load %arg3[%c0_2, %c0_3] : memref<8x256xf32, #tpu.memory_space<vmem>>, vector<8x256xf32>
    %c0_4 = arith.constant 0 : index
    %c0_5 = arith.constant 0 : index
    %5 = vector.load %arg4[%c0_4, %c0_5] : memref<8x256xf32, #tpu.memory_space<vmem>>, vector<8x256xf32>
    %cst = arith.constant 0.000000e+00 : f32
    %6 = vector.broadcast %cst : f32 to vector<8x256xf32>
    %7 = arith.subf %6, %3 : vector<8x256xf32>
    %cst_6 = arith.constant 0.000000e+00 : f32
    %8 = vector.broadcast %cst_6 : f32 to vector<8x256xf32>
    %9 = arith.maximumf %7, %8 : vector<8x256xf32>
    %10 = math.absf %7 : vector<8x256xf32>
    %cst_7 = arith.constant 0.000000e+00 : f32
    %11 = vector.broadcast %cst_7 : f32 to vector<8x256xf32>
    %12 = arith.subf %11, %10 : vector<8x256xf32>
    %13 = math.exp %12 : vector<8x256xf32>
    %cst_8 = arith.constant 1.000000e+00 : f32
    %14 = vector.broadcast %cst_8 : f32 to vector<8x256xf32>
    %15 = arith.addf %14, %13 : vector<8x256xf32>
    %16 = math.log %15 : vector<8x256xf32>
    %17 = arith.addf %9, %16 : vector<8x256xf32>
    %cst_9 = arith.constant 0.000000e+00 : f32
    %18 = vector.broadcast %cst_9 : f32 to vector<8x256xf32>
    %19 = arith.maximumf %4, %18 : vector<8x256xf32>
    %20 = math.absf %4 : vector<8x256xf32>
    %cst_10 = arith.constant 0.000000e+00 : f32
    %21 = vector.broadcast %cst_10 : f32 to vector<8x256xf32>
    %22 = arith.subf %21, %20 : vector<8x256xf32>
    %23 = math.exp %22 : vector<8x256xf32>
    %cst_11 = arith.constant 1.000000e+00 : f32
    %24 = vector.broadcast %cst_11 : f32 to vector<8x256xf32>
    %25 = arith.addf %24, %23 : vector<8x256xf32>
    %26 = math.log %25 : vector<8x256xf32>
    %27 = arith.addf %19, %26 : vector<8x256xf32>
    %28 = arith.addf %17, %27 : vector<8x256xf32>
    %c0_12 = arith.constant 0 : index
    %c0_13 = arith.constant 0 : index
    %29 = vector.load %arg5[%c0_12, %c0_13] : memref<8x256xf32, #tpu.memory_space<vmem>>, vector<8x256xf32>
    %30 = arith.mulf %28, %5 : vector<8x256xf32>
    %31 = vector.shape_cast %30 : vector<8x256xf32> to vector<1x8x256xf32>
    %cst_14 = arith.constant dense<0.000000e+00> : vector<8x256xf32>
    %32 = vector.multi_reduction <add>, %31, %cst_14 [0] : vector<1x8x256xf32> to vector<8x256xf32>
    %33 = arith.addf %29, %32 : vector<8x256xf32>
    %c0_15 = arith.constant 0 : index
    %c0_16 = arith.constant 0 : index
    %34 = vector.load %arg5[%c0_15, %c0_16] : memref<8x256xf32, #tpu.memory_space<vmem>>, vector<8x256xf32>
    tpu.vector_store %arg5[%c0_15, %c0_16], %33 {strides = array<i32>} : memref<8x256xf32, #tpu.memory_space<vmem>>, vector<8x256xf32>,
    %c0_17 = arith.constant 0 : index
    %c0_18 = arith.constant 0 : index
    %35 = vector.load %arg6[%c0_17, %c0_18] : memref<8x256xf32, #tpu.memory_space<vmem>>, vector<8x256xf32>
    %36 = vector.shape_cast %5 : vector<8x256xf32> to vector<1x8x256xf32>
    %cst_19 = arith.constant dense<0.000000e+00> : vector<8x256xf32>
    %37 = vector.multi_reduction <add>, %36, %cst_19 [0] : vector<1x8x256xf32> to vector<8x256xf32>
    %38 = arith.addf %35, %37 : vector<8x256xf32>
    %c0_20 = arith.constant 0 : index
    %c0_21 = arith.constant 0 : index
    %39 = vector.load %arg6[%c0_20, %c0_21] : memref<8x256xf32, #tpu.memory_space<vmem>>, vector<8x256xf32>
    tpu.vector_store %arg6[%c0_20, %c0_21], %38 {strides = array<i32>} : memref<8x256xf32, #tpu.memory_space<vmem>>, vector<8x256xf32>,
    return
  }
  func.func @transform_0(%arg0: i32, %arg1: i32) -> (i32, i32) {
    %c1_i32 = arith.constant 1 : i32
    %0 = arith.muli %arg0, %c1_i32 : i32
    %1 = arith.addi %0, %arg1 : i32
    %c0_i32 = arith.constant 0 : i32
    %2 = arith.minsi %1, %c0_i32 : i32
    %c0_i32_0 = arith.constant 0 : i32
    %c0_i32_1 = arith.constant 0 : i32
    return %2, %c0_i32_0 : i32, i32
  }
  func.func @transform_1(%arg0: i32, %arg1: i32) -> (i32, i32) {
    %c1_i32 = arith.constant 1 : i32
    %0 = arith.muli %arg0, %c1_i32 : i32
    %1 = arith.addi %0, %arg1 : i32
    %c0_i32 = arith.constant 0 : i32
    %2 = arith.minsi %1, %c0_i32 : i32
    %c0_i32_0 = arith.constant 0 : i32
    %c0_i32_1 = arith.constant 0 : i32
    return %2, %c0_i32_0 : i32, i32
  }
  func.func @transform_2(%arg0: i32, %arg1: i32) -> (i32, i32) {
    %c1_i32 = arith.constant 1 : i32
    %0 = arith.muli %arg0, %c1_i32 : i32
    %1 = arith.addi %0, %arg1 : i32
    %c0_i32 = arith.constant 0 : i32
    %2 = arith.minsi %1, %c0_i32 : i32
    %c0_i32_0 = arith.constant 0 : i32
    %c0_i32_1 = arith.constant 0 : i32
    return %2, %c0_i32_0 : i32, i32
  }
  func.func @transform_3(%arg0: i32, %arg1: i32) -> (i32, i32) {
    %c0_i32 = arith.constant 0 : i32
    %c0_i32_0 = arith.constant 0 : i32
    return %arg0, %c0_i32 : i32, i32
  }
  func.func @transform_4(%arg0: i32, %arg1: i32) -> (i32, i32) {
    %c0_i32 = arith.constant 0 : i32
    %c0_i32_0 = arith.constant 0 : i32
    return %arg0, %c0_i32 : i32, i32
  }
}

</mosaic_0001>

<bundles_post_ra>
// kernel: pointwise_ce_loss.1
= control target key start
LH: loop header
LB: loop body
LE: loop exit
PB: predicated region body
PF: predicated region fallthrough
CT: control target
= control target key end

     0   :  { %s276_s0 = inlined_call_operand.vmem [shape: f32[8,256], index: 0, kind: input, shape index: {}]   ;;  %s277_s1 = inlined_call_operand.vmem [shape: f32[8,256], index: 1, kind: input, shape index: {}]   ;;  %s278_s2 = inlined_call_operand.vmem [shape: f32[8,256], index: 2, kind: input, shape index: {}]   ;;  %s279_s4 = inlined_call_operand.vmem [shape: f32[8,256], index: 4, kind: output, shape index: {1}]   ;;  %s280_s3 = inlined_call_operand.vmem [shape: f32[8,256], index: 3, kind: output, shape index: {0}]  }
   0x1   :  { %v114_v0 = vld [vmem:[%s276_s0] sm:$0xff]  ;;  %v115_v5 = vld [vmem:[%s276_s0 + $0x8] sm:$0xff] }
   0x2   :  { %v116_v1 = vld [vmem:[%s277_s1] sm:$0xff]  ;;  %v120_v3 = vsub.f32 0.0, %v114_v0  ;;  %v117_v6 = vld [vmem:[%s277_s1 + $0x8] sm:$0xff]  ;;  %v121_v8 = vsub.f32 0.0, %v115_v5 }
   0x3   :  { %v118_v2 = vld [vmem:[%s278_s2] sm:$0xff]  ;;  %v142_v4 = vand.u32 2147483647, %v116_v1  ;;  %v119_v7 = vld [vmem:[%s278_s2 + $0x8] sm:$0xff]  ;;  %v143_v9 = vand.u32 2147483647, %v117_v6 }
   0x4   :  { %v124_v10 = vand.u32 2147483647, %v120_v3  ;;  %176 = vst [vmem:[%s279_s4] sm:$0xff] %v118_v2  ;;  %v125_v12 = vand.u32 2147483647, %v121_v8  ;;  %177 = vst [vmem:[%s279_s4 + $0x8] sm:$0xff] %v119_v7  ;;  %v140_v28 = vmax.f32 %v116_v1, 0.0 }
   0x5   :  { %v144_v11 = vsub.f32 0.0, %v142_v4  ;;  %v145_v13 = vsub.f32 0.0, %v143_v9  ;;  %v141_v30 = vmax.f32 %v117_v6, 0.0  ;;  %v122_v32 = vmax.f32 %v120_v3, 0.0 }
   0x6   :  { %v126_v14 = vsub.f32 0.0, %v124_v10  ;;  %v127_v16 = vsub.f32 0.0, %v125_v12  ;;  %v123_v35 = vmax.f32 %v121_v8, 0.0 }
   0x7   :  { %v146_v15 = vmul.f32 1.442695, %v144_v11  ;;  %v148_v17 = vmul.f32 1.442695, %v145_v13 }
   0x8   :  { %v128_v18 = vmul.f32 1.442695, %v126_v14  ;;  %v130_v19 = vmul.f32 1.442695, %v127_v16 }
   0x9   :  { %205 = vpow2.f32 %v146_v15 }
   0xa   :  { %207 = vpow2.f32 %v148_v17 }
   0xb   :  { %209 = vpow2.f32 %v128_v18 }
   0xc   :  { %211 = vpow2.f32 %v130_v19 }
  0x13   :  { %v206_v20 = vpop.eup %205 }
  0x14   :  { %v208_v21 = vpop.eup %207  ;;  %v150_v22 = vadd.f32 1.0, %v206_v20 }
  0x15   :  { %v210_v23 = vpop.eup %209  ;;  %v151_v24 = vadd.f32 1.0, %v208_v21 }
  0x16   :  { %v212_v25 = vpop.eup %211  ;;  %v132_v26 = vadd.f32 1.0, %v210_v23  ;;  %213 = vlog2.f32 %v150_v22 }
  0x17   :  { %v133_v27 = vadd.f32 1.0, %v212_v25  ;;  %215 = vlog2.f32 %v151_v24 }
  0x18   :  { %217 = vlog2.f32 %v132_v26 }
  0x19   :  { %219 = vlog2.f32 %v133_v27 }
  0x20   :  { %v214_v29 = vpop.eup %213 }
  0x21   :  { %v216_v31 = vpop.eup %215  ;;  %v153_v33 = vmul.f32 0.6931472, %v214_v29 }
  0x22   :  { %v218_v34 = vpop.eup %217  ;;  %v155_v36 = vmul.f32 0.6931472, %v216_v31 }
  0x23   :  { %v220_v37 = vpop.eup %219  ;;  %v135_v38 = vmul.f32 0.6931472, %v218_v34  ;;  %v156_v39 = vadd.f32 %v153_v33, %v140_v28 }
  0x24   :  { %v137_v40 = vmul.f32 0.6931472, %v220_v37  ;;  %v157_v41 = vadd.f32 %v155_v36, %v141_v30 }
  0x25   :  { %v138_v42 = vadd.f32 %v135_v38, %v122_v32 }
  0x26   :  { %v139_v43 = vadd.f32 %v137_v40, %v123_v35 }
  0x27   :  { %v158_v44 = vadd.f32 %v156_v39, %v138_v42 }
  0x28   :  { %v159_v45 = vadd.f32 %v157_v41, %v139_v43 }
  0x29   :  { %v162_v46 = vmul.f32 %v158_v44, %v118_v2 }
  0x2a   :  { %v163_v47 = vmul.f32 %v159_v45, %v119_v7 }
  0x2b   :  { %168 = vst [vmem:[%s280_s3] sm:$0xff] %v162_v46 }
  0x2c   :  { %169 = vst [vmem:[%s280_s3 + $0x8] sm:$0xff] %v163_v47 }

</bundles_post_ra>
